<compile_context>
chip_gen: v5e
topology: v5e:2x2
jax: 0.10.0
libtpu: 0.0.40
codegen_flags: <defaults>
</compile_context>

<pallas_src>
import functools

import jax
import jax.numpy as jnp
from jax import lax
from jax.experimental import pallas as pl
from jax.experimental.pallas import tpu as pltpu


# ----------------------------- in-kernel math helpers -----------------------------

_SQRT_2_OVER_PI = 0.7978845608028654
_GELU_COEFF = 0.044715


def _gelu_tanh(x):
    # tanh-approximate GELU: one EUP tanh instead of the erf polynomial chain.
    # |gelu_tanh - gelu_exact| < ~1e-3, negligible after LayerNorm at this tolerance.
    return 0.5 * x * (1.0 + jnp.tanh(_SQRT_2_OVER_PI * (x + _GELU_COEFF * x * x * x)))


def _softmax_last(x):
    m = jnp.max(x, axis=-1, keepdims=True)
    e = jnp.exp(x - m)
    return e * pl.reciprocal(jnp.sum(e, axis=-1, keepdims=True), approx=True)


def _log_softmax(x, axis):
    m = jnp.max(x, axis=axis, keepdims=True)
    s = x - m
    return s - jnp.log(jnp.sum(jnp.exp(s), axis=axis, keepdims=True))


def _matmul_nt(a_bf16, b_bf16):
    # a @ b.T on the MXU (contract last dims), bf16 operands, f32 accumulation.
    return lax.dot_general(a_bf16, b_bf16,
                           dimension_numbers=(((1,), (1,)), ((), ())),
                           preferred_element_type=jnp.float32)


def _projection_head(x_f32, wp_bf16, wf_bf16, bp, bf, gamma, beta):
    # Linear -> GELU -> Linear -> (dropout = identity in eval) -> +residual -> LayerNorm
    projected = jnp.dot(x_f32.astype(jnp.bfloat16), wp_bf16,
                        preferred_element_type=jnp.float32) + bp
    h = _gelu_tanh(projected)
    h = jnp.dot(h.astype(jnp.bfloat16), wf_bf16,
                preferred_element_type=jnp.float32) + bf
    h = h + projected
    inv_d = 1.0 / h.shape[-1]
    mean = jnp.sum(h, axis=-1, keepdims=True) * inv_d
    c = h - mean
    var = jnp.sum(c * c, axis=-1, keepdims=True) * inv_d
    h = c * lax.rsqrt(var + 1e-5)          # PyTorch LayerNorm eps=1e-5, biased var
    return h * gamma + beta


# --------------------------------- Pallas kernel -----------------------------------

def clip_loss_kernel(src_ref, tgt_ref,
                     wip_ref, wif_ref, wtp_ref, wtf_ref,
                     small_ref, loss_ref, *, inv_temperature, temperature):
    # Packed small params: rows 0..3 = img (bp, bf, gamma, beta), rows 4..7 = txt.
    sp = small_ref[...]
    img = _projection_head(src_ref[...], wip_ref[...], wif_ref[...],
                           sp[0:1, :], sp[1:2, :], sp[2:3, :], sp[3:4, :])
    txt = _projection_head(tgt_ref[...], wtp_ref[...], wtf_ref[...],
                           sp[4:5, :], sp[5:6, :], sp[6:7, :], sp[7:8, :])

    img_b = img.astype(jnp.bfloat16)
    txt_b = txt.astype(jnp.bfloat16)
    logits = _matmul_nt(txt_b, img_b) * inv_temperature      # (B, B)
    images_similarity = _matmul_nt(img_b, img_b)              # (B, B)
    texts_similarity = _matmul_nt(txt_b, txt_b)               # (B, B)
    soft_targets = _softmax_last((images_similarity + texts_similarity)
                                 * (0.5 * temperature))

    # texts_loss uses log_softmax over rows, images_loss over columns of the SAME
    # logits matrix (mathematically identical to the .T formulation, but with no
    # XLU transposes); final mean folds into one full sum * 1/(2B).
    lsm = _log_softmax(logits, axis=-1) + _log_softmax(logits, axis=0)
    b = logits.shape[0]
    loss_ref[0, 0] = jnp.sum(-soft_targets * lsm) * (0.5 / b)


# ----------------------------------- wrapper ---------------------------------------

def clip_forward(sources, targets, params, temperature):
    pi, pt = params["img"], params["txt"]
    # Pack the eight tiny (1, P) params into a single (8, P) f32 array.
    small = jnp.concatenate(
        [pi["bp"], pi["bf"], pi["gamma"], pi["beta"],
         pt["bp"], pt["bf"], pt["gamma"], pt["beta"]], axis=0).astype(jnp.float32)
    args = (
        sources, targets,
        pi["wp"].astype(jnp.bfloat16), pi["wf"].astype(jnp.bfloat16),
        pt["wp"].astype(jnp.bfloat16), pt["wf"].astype(jnp.bfloat16),
        small,
    )
    kernel = functools.partial(clip_loss_kernel,
                               inv_temperature=1.0 / float(temperature),
                               temperature=float(temperature))
    out = pl.pallas_call(
        kernel,
        out_shape=jax.ShapeDtypeStruct((1, 1), jnp.float32),
        in_specs=[pl.BlockSpec(memory_space=pltpu.MemorySpace.VMEM)] * len(args),
        out_specs=pl.BlockSpec(memory_space=pltpu.MemorySpace.SMEM),
    )(*args)
    return out[0, 0]


# ----------------------------- pure-JAX reference (check) --------------------------

def _ref_projection_head(x, wp, bp, wf, bf, gamma, beta):
    projected = x @ wp + bp
    h = jax.nn.gelu(projected, approximate=False)
    h = h @ wf + bf
    h = h + projected
    mean = h.mean(-1, keepdims=True)
    var = ((h - mean) ** 2).mean(-1, keepdims=True)
    h = (h - mean) / jnp.sqrt(var + 1e-5)
    return h * gamma + beta


def _ref_clip(sources, targets, params, temperature):
    pi, pt = params["img"], params["txt"]
    img = _ref_projection_head(sources, pi["wp"], pi["bp"], pi["wf"], pi["bf"],
                               pi["gamma"], pi["beta"])
    txt = _ref_projection_head(targets, pt["wp"], pt["bp"], pt["wf"], pt["bf"],
                               pt["gamma"], pt["beta"])
    logits = txt @ img.T / temperature
    images_similarity = img @ img.T
    texts_similarity = txt @ txt.T
    t = jax.nn.softmax((images_similarity + texts_similarity) / 2.0 * temperature, axis=-1)
    texts_loss = (-t * jax.nn.log_softmax(logits, axis=-1)).sum(1)
    images_loss = (-t.T * jax.nn.log_softmax(logits.T, axis=-1)).sum(1)
    return ((images_loss + texts_loss) / 2.0).mean()


# ------------------------------------- main -----------------------------------------

def _init_head(key, embedding_dim, projection_dim):
    k = jax.random.split(key, 4)
    return {
        "wp": 0.02 * jax.random.normal(k[0], (embedding_dim, projection_dim), jnp.float32),
        "bp": 0.02 * jax.random.normal(k[1], (1, projection_dim), jnp.float32),
        "wf": 0.02 * jax.random.normal(k[2], (projection_dim, projection_dim), jnp.float32),
        "bf": 0.02 * jax.random.normal(k[3], (1, projection_dim), jnp.float32),
        "gamma": jnp.ones((1, projection_dim), jnp.float32),
        "beta": jnp.zeros((1, projection_dim), jnp.float32),
    }


if __name__ == "__main__":
    config = {
        "temperature": 1.0,
        "image_embedding": 256,
        "text_embedding": 128,
        "projection_dim": 128,
        "dropout": 0.1,   # identity at inference
    }
    B = 8

    key = jax.random.PRNGKey(0)
    k_img, k_txt, k_src, k_tgt = jax.random.split(key, 4)
    params = {
        "img": _init_head(k_img, config["image_embedding"], config["projection_dim"]),
        "txt": _init_head(k_txt, config["text_embedding"], config["projection_dim"]),
    }
    sources = jax.random.normal(k_src, (B, config["image_embedding"]), jnp.float32)
    targets = jax.random.normal(k_tgt, (B, config["text_embedding"]), jnp.float32)

    loss_fn = jax.jit(functools.partial(clip_forward, temperature=config["temperature"]))
    loss = loss_fn(sources, targets, params)
    jax.block_until_ready(loss)

    ref = _ref_clip(sources, targets, params, config["temperature"])
    assert jnp.isfinite(loss), "kernel produced non-finite loss"
    # Tolerance accounts for bf16 MXU operands (f32 accumulate) + tanh-GELU approximation.
    assert jnp.allclose(loss, ref, atol=5e-2, rtol=2e-2), (loss, ref)

    print("KERNEL_OK")
</pallas_src>

<mosaic_0001>
module attributes {stable_mosaic.version = 11 : i64} {
  func.func @clip_loss_kernel(%arg0: memref<8x256xf32, #tpu.memory_space<vmem>>, %arg1: memref<8x128xf32, #tpu.memory_space<vmem>>, %arg2: memref<256x128xbf16, #tpu.memory_space<vmem>>, %arg3: memref<128x128xbf16, #tpu.memory_space<vmem>>, %arg4: memref<128x128xbf16, #tpu.memory_space<vmem>>, %arg5: memref<128x128xbf16, #tpu.memory_space<vmem>>, %arg6: memref<8x128xf32, #tpu.memory_space<vmem>>, %arg7: memref<1x1xf32, #tpu.memory_space<smem>>) attributes {dimension_semantics = [], scalar_prefetch = 0 : i64, scratch_operands = 0 : i64, tpu.core_type = #tpu.core_type<tc>} {
    %c0 = arith.constant 0 : index
    %c0_0 = arith.constant 0 : index
    %0 = vector.load %arg6[%c0, %c0_0] : memref<8x128xf32, #tpu.memory_space<vmem>>, vector<8x128xf32>
    %c0_1 = arith.constant 0 : index
    %c0_2 = arith.constant 0 : index
    %1 = vector.load %arg0[%c0_1, %c0_2] : memref<8x256xf32, #tpu.memory_space<vmem>>, vector<8x256xf32>
    %c0_3 = arith.constant 0 : index
    %c0_4 = arith.constant 0 : index
    %2 = vector.load %arg2[%c0_3, %c0_4] : memref<256x128xbf16, #tpu.memory_space<vmem>>, vector<256x128xbf16>
    %c0_5 = arith.constant 0 : index
    %c0_6 = arith.constant 0 : index
    %3 = vector.load %arg3[%c0_5, %c0_6] : memref<128x128xbf16, #tpu.memory_space<vmem>>, vector<128x128xbf16>
    %4 = vector.extract_strided_slice %0 {offsets = [0, 0], sizes = [1, 128], strides = [1, 1]} : vector<8x128xf32> to vector<1x128xf32>
    %5 = vector.extract_strided_slice %0 {offsets = [1, 0], sizes = [1, 128], strides = [1, 1]} : vector<8x128xf32> to vector<1x128xf32>
    %6 = vector.extract_strided_slice %0 {offsets = [2, 0], sizes = [1, 128], strides = [1, 1]} : vector<8x128xf32> to vector<1x128xf32>
    %7 = vector.extract_strided_slice %0 {offsets = [3, 0], sizes = [1, 128], strides = [1, 1]} : vector<8x128xf32> to vector<1x128xf32>
    %8 = arith.truncf %1 : vector<8x256xf32> to vector<8x256xbf16>
    %cst = arith.constant dense<0.000000e+00> : vector<8x128xf32>
    %9 = tpu.matmul %8, %2, %cst {dimension_numbers = #tpu.dot_dimension_numbers<[1], [0], [0], [1], [0, 0, 1, 1], [], []>} : vector<8x256xbf16>, vector<256x128xbf16>, vector<8x128xf32> -> vector<8x128xf32>
    %10 = vector.broadcast %4 : vector<1x128xf32> to vector<8x128xf32>
    %11 = arith.addf %9, %10 : vector<8x128xf32>
    %cst_7 = arith.constant 5.000000e-01 : f32
    %12 = vector.broadcast %cst_7 : f32 to vector<8x128xf32>
    %13 = arith.mulf %12, %11 : vector<8x128xf32>
    %cst_8 = arith.constant 4.471500e-02 : f32
    %14 = vector.broadcast %cst_8 : f32 to vector<8x128xf32>
    %15 = arith.mulf %14, %11 : vector<8x128xf32>
    %16 = arith.mulf %15, %11 : vector<8x128xf32>
    %17 = arith.mulf %16, %11 : vector<8x128xf32>
    %18 = arith.addf %11, %17 : vector<8x128xf32>
    %cst_9 = arith.constant 0.797884583 : f32
    %19 = vector.broadcast %cst_9 : f32 to vector<8x128xf32>
    %20 = arith.mulf %19, %18 : vector<8x128xf32>
    %21 = math.tanh %20 : vector<8x128xf32>
    %cst_10 = arith.constant 1.000000e+00 : f32
    %22 = vector.broadcast %cst_10 : f32 to vector<8x128xf32>
    %23 = arith.addf %22, %21 : vector<8x128xf32>
    %24 = arith.mulf %13, %23 : vector<8x128xf32>
    %25 = arith.truncf %24 : vector<8x128xf32> to vector<8x128xbf16>
    %cst_11 = arith.constant dense<0.000000e+00> : vector<8x128xf32>
    %26 = tpu.matmul %25, %3, %cst_11 {dimension_numbers = #tpu.dot_dimension_numbers<[1], [0], [0], [1], [0, 0, 1, 1], [], []>} : vector<8x128xbf16>, vector<128x128xbf16>, vector<8x128xf32> -> vector<8x128xf32>
    %27 = vector.broadcast %5 : vector<1x128xf32> to vector<8x128xf32>
    %28 = arith.addf %26, %27 : vector<8x128xf32>
    %29 = arith.addf %28, %11 : vector<8x128xf32>
    %cst_12 = arith.constant dense<0.000000e+00> : vector<8xf32>
    %30 = vector.multi_reduction <add>, %29, %cst_12 [1] : vector<8x128xf32> to vector<8xf32>
    %31 = vector.shape_cast %30 : vector<8xf32> to vector<8x1xf32>
    %cst_13 = arith.constant 7.812500e-03 : f32
    %32 = vector.broadcast %cst_13 : f32 to vector<8x1xf32>
    %33 = arith.mulf %31, %32 : vector<8x1xf32>
    %34 = vector.broadcast %33 : vector<8x1xf32> to vector<8x128xf32>
    %35 = arith.subf %29, %34 : vector<8x128xf32>
    %36 = arith.mulf %35, %35 : vector<8x128xf32>
    %cst_14 = arith.constant dense<0.000000e+00> : vector<8xf32>
    %37 = vector.multi_reduction <add>, %36, %cst_14 [1] : vector<8x128xf32> to vector<8xf32>
    %38 = vector.shape_cast %37 : vector<8xf32> to vector<8x1xf32>
    %cst_15 = arith.constant 7.812500e-03 : f32
    %39 = vector.broadcast %cst_15 : f32 to vector<8x1xf32>
    %40 = arith.mulf %38, %39 : vector<8x1xf32>
    %cst_16 = arith.constant 9.99999974E-6 : f32
    %41 = vector.broadcast %cst_16 : f32 to vector<8x1xf32>
    %42 = arith.addf %40, %41 : vector<8x1xf32>
    %43 = math.rsqrt %42 : vector<8x1xf32>
    %44 = vector.broadcast %43 : vector<8x1xf32> to vector<8x128xf32>
    %45 = arith.mulf %35, %44 : vector<8x128xf32>
    %46 = vector.broadcast %6 : vector<1x128xf32> to vector<8x128xf32>
    %47 = arith.mulf %45, %46 : vector<8x128xf32>
    %48 = vector.broadcast %7 : vector<1x128xf32> to vector<8x128xf32>
    %49 = arith.addf %47, %48 : vector<8x128xf32>
    %c0_17 = arith.constant 0 : index
    %c0_18 = arith.constant 0 : index
    %50 = vector.load %arg1[%c0_17, %c0_18] : memref<8x128xf32, #tpu.memory_space<vmem>>, vector<8x128xf32>
    %c0_19 = arith.constant 0 : index
    %c0_20 = arith.constant 0 : index
    %51 = vector.load %arg4[%c0_19, %c0_20] : memref<128x128xbf16, #tpu.memory_space<vmem>>, vector<128x128xbf16>
    %c0_21 = arith.constant 0 : index
    %c0_22 = arith.constant 0 : index
    %52 = vector.load %arg5[%c0_21, %c0_22] : memref<128x128xbf16, #tpu.memory_space<vmem>>, vector<128x128xbf16>
    %53 = vector.extract_strided_slice %0 {offsets = [4, 0], sizes = [1, 128], strides = [1, 1]} : vector<8x128xf32> to vector<1x128xf32>
    %54 = vector.extract_strided_slice %0 {offsets = [5, 0], sizes = [1, 128], strides = [1, 1]} : vector<8x128xf32> to vector<1x128xf32>
    %55 = vector.extract_strided_slice %0 {offsets = [6, 0], sizes = [1, 128], strides = [1, 1]} : vector<8x128xf32> to vector<1x128xf32>
    %56 = vector.extract_strided_slice %0 {offsets = [7, 0], sizes = [1, 128], strides = [1, 1]} : vector<8x128xf32> to vector<1x128xf32>
    %57 = arith.truncf %50 : vector<8x128xf32> to vector<8x128xbf16>
    %cst_23 = arith.constant dense<0.000000e+00> : vector<8x128xf32>
    %58 = tpu.matmul %57, %51, %cst_23 {dimension_numbers = #tpu.dot_dimension_numbers<[1], [0], [0], [1], [0, 0, 1, 1], [], []>} : vector<8x128xbf16>, vector<128x128xbf16>, vector<8x128xf32> -> vector<8x128xf32>
    %59 = vector.broadcast %53 : vector<1x128xf32> to vector<8x128xf32>
    %60 = arith.addf %58, %59 : vector<8x128xf32>
    %cst_24 = arith.constant 5.000000e-01 : f32
    %61 = vector.broadcast %cst_24 : f32 to vector<8x128xf32>
    %62 = arith.mulf %61, %60 : vector<8x128xf32>
    %cst_25 = arith.constant 4.471500e-02 : f32
    %63 = vector.broadcast %cst_25 : f32 to vector<8x128xf32>
    %64 = arith.mulf %63, %60 : vector<8x128xf32>
    %65 = arith.mulf %64, %60 : vector<8x128xf32>
    %66 = arith.mulf %65, %60 : vector<8x128xf32>
    %67 = arith.addf %60, %66 : vector<8x128xf32>
    %cst_26 = arith.constant 0.797884583 : f32
    %68 = vector.broadcast %cst_26 : f32 to vector<8x128xf32>
    %69 = arith.mulf %68, %67 : vector<8x128xf32>
    %70 = math.tanh %69 : vector<8x128xf32>
    %cst_27 = arith.constant 1.000000e+00 : f32
    %71 = vector.broadcast %cst_27 : f32 to vector<8x128xf32>
    %72 = arith.addf %71, %70 : vector<8x128xf32>
    %73 = arith.mulf %62, %72 : vector<8x128xf32>
    %74 = arith.truncf %73 : vector<8x128xf32> to vector<8x128xbf16>
    %cst_28 = arith.constant dense<0.000000e+00> : vector<8x128xf32>
    %75 = tpu.matmul %74, %52, %cst_28 {dimension_numbers = #tpu.dot_dimension_numbers<[1], [0], [0], [1], [0, 0, 1, 1], [], []>} : vector<8x128xbf16>, vector<128x128xbf16>, vector<8x128xf32> -> vector<8x128xf32>
    %76 = vector.broadcast %54 : vector<1x128xf32> to vector<8x128xf32>
    %77 = arith.addf %75, %76 : vector<8x128xf32>
    %78 = arith.addf %77, %60 : vector<8x128xf32>
    %cst_29 = arith.constant dense<0.000000e+00> : vector<8xf32>
    %79 = vector.multi_reduction <add>, %78, %cst_29 [1] : vector<8x128xf32> to vector<8xf32>
    %80 = vector.shape_cast %79 : vector<8xf32> to vector<8x1xf32>
    %cst_30 = arith.constant 7.812500e-03 : f32
    %81 = vector.broadcast %cst_30 : f32 to vector<8x1xf32>
    %82 = arith.mulf %80, %81 : vector<8x1xf32>
    %83 = vector.broadcast %82 : vector<8x1xf32> to vector<8x128xf32>
    %84 = arith.subf %78, %83 : vector<8x128xf32>
    %85 = arith.mulf %84, %84 : vector<8x128xf32>
    %cst_31 = arith.constant dense<0.000000e+00> : vector<8xf32>
    %86 = vector.multi_reduction <add>, %85, %cst_31 [1] : vector<8x128xf32> to vector<8xf32>
    %87 = vector.shape_cast %86 : vector<8xf32> to vector<8x1xf32>
    %cst_32 = arith.constant 7.812500e-03 : f32
    %88 = vector.broadcast %cst_32 : f32 to vector<8x1xf32>
    %89 = arith.mulf %87, %88 : vector<8x1xf32>
    %cst_33 = arith.constant 9.99999974E-6 : f32
    %90 = vector.broadcast %cst_33 : f32 to vector<8x1xf32>
    %91 = arith.addf %89, %90 : vector<8x1xf32>
    %92 = math.rsqrt %91 : vector<8x1xf32>
    %93 = vector.broadcast %92 : vector<8x1xf32> to vector<8x128xf32>
    %94 = arith.mulf %84, %93 : vector<8x128xf32>
    %95 = vector.broadcast %55 : vector<1x128xf32> to vector<8x128xf32>
    %96 = arith.mulf %94, %95 : vector<8x128xf32>
    %97 = vector.broadcast %56 : vector<1x128xf32> to vector<8x128xf32>
    %98 = arith.addf %96, %97 : vector<8x128xf32>
    %99 = arith.truncf %49 : vector<8x128xf32> to vector<8x128xbf16>
    %100 = arith.truncf %98 : vector<8x128xf32> to vector<8x128xbf16>
    %cst_34 = arith.constant dense<0.000000e+00> : vector<8x8xf32>
    %101 = tpu.matmul %100, %99, %cst_34 {dimension_numbers = #tpu.dot_dimension_numbers<[1], [1], [0], [0], [0, 0, 1, 0], [], []>} : vector<8x128xbf16>, vector<8x128xbf16>, vector<8x8xf32> -> vector<8x8xf32>
    %cst_35 = arith.constant 1.000000e+00 : f32
    %102 = vector.broadcast %cst_35 : f32 to vector<8x8xf32>
    %103 = arith.mulf %101, %102 : vector<8x8xf32>
    %cst_36 = arith.constant dense<0.000000e+00> : vector<8x8xf32>
    %104 = tpu.matmul %99, %99, %cst_36 {dimension_numbers = #tpu.dot_dimension_numbers<[1], [1], [0], [0], [0, 0, 1, 0], [], []>} : vector<8x128xbf16>, vector<8x128xbf16>, vector<8x8xf32> -> vector<8x8xf32>
    %cst_37 = arith.constant dense<0.000000e+00> : vector<8x8xf32>
    %105 = tpu.matmul %100, %100, %cst_37 {dimension_numbers = #tpu.dot_dimension_numbers<[1], [1], [0], [0], [0, 0, 1, 0], [], []>} : vector<8x128xbf16>, vector<8x128xbf16>, vector<8x8xf32> -> vector<8x8xf32>
    %106 = arith.addf %104, %105 : vector<8x8xf32>
    %cst_38 = arith.constant 5.000000e-01 : f32
    %107 = vector.broadcast %cst_38 : f32 to vector<8x8xf32>
    %108 = arith.mulf %106, %107 : vector<8x8xf32>
    %cst_39 = arith.constant dense<0xFF800000> : vector<8xf32>
    %109 = vector.multi_reduction <maximumf>, %108, %cst_39 [1] : vector<8x8xf32> to vector<8xf32>
    %110 = vector.shape_cast %109 : vector<8xf32> to vector<8x1xf32>
    %111 = vector.broadcast %110 : vector<8x1xf32> to vector<8x8xf32>
    %112 = arith.subf %108, %111 : vector<8x8xf32>
    %113 = math.exp %112 : vector<8x8xf32>
    %cst_40 = arith.constant dense<0.000000e+00> : vector<8xf32>
    %114 = vector.multi_reduction <add>, %113, %cst_40 [1] : vector<8x8xf32> to vector<8xf32>
    %115 = vector.shape_cast %114 : vector<8xf32> to vector<8x1xf32>
    %116 = tpu.reciprocal %115 {approx = true} : vector<8x1xf32> -> vector<8x1xf32>
    %117 = vector.broadcast %116 : vector<8x1xf32> to vector<8x8xf32>
    %118 = arith.mulf %113, %117 : vector<8x8xf32>
    %cst_41 = arith.constant dense<0xFF800000> : vector<8xf32>
    %119 = vector.multi_reduction <maximumf>, %103, %cst_41 [1] : vector<8x8xf32> to vector<8xf32>
    %120 = vector.shape_cast %119 : vector<8xf32> to vector<8x1xf32>
    %121 = vector.broadcast %120 : vector<8x1xf32> to vector<8x8xf32>
    %122 = arith.subf %103, %121 : vector<8x8xf32>
    %123 = math.exp %122 : vector<8x8xf32>
    %cst_42 = arith.constant dense<0.000000e+00> : vector<8xf32>
    %124 = vector.multi_reduction <add>, %123, %cst_42 [1] : vector<8x8xf32> to vector<8xf32>
    %125 = vector.shape_cast %124 : vector<8xf32> to vector<8x1xf32>
    %126 = math.log %125 : vector<8x1xf32>
    %127 = vector.broadcast %126 : vector<8x1xf32> to vector<8x8xf32>
    %128 = arith.subf %122, %127 : vector<8x8xf32>
    %cst_43 = arith.constant dense<0xFF800000> : vector<8xf32>
    %129 = vector.multi_reduction <maximumf>, %103, %cst_43 [0] : vector<8x8xf32> to vector<8xf32>
    %130 = vector.shape_cast %129 : vector<8xf32> to vector<1x8xf32>
    %131 = vector.broadcast %130 : vector<1x8xf32> to vector<8x8xf32>
    %132 = arith.subf %103, %131 : vector<8x8xf32>
    %133 = math.exp %132 : vector<8x8xf32>
    %cst_44 = arith.constant dense<0.000000e+00> : vector<8xf32>
    %134 = vector.multi_reduction <add>, %133, %cst_44 [0] : vector<8x8xf32> to vector<8xf32>
    %135 = vector.shape_cast %134 : vector<8xf32> to vector<1x8xf32>
    %136 = math.log %135 : vector<1x8xf32>
    %137 = vector.broadcast %136 : vector<1x8xf32> to vector<8x8xf32>
    %138 = arith.subf %132, %137 : vector<8x8xf32>
    %139 = arith.addf %128, %138 : vector<8x8xf32>
    %cst_45 = arith.constant 0.000000e+00 : f32
    %140 = vector.broadcast %cst_45 : f32 to vector<8x8xf32>
    %141 = arith.subf %140, %118 : vector<8x8xf32>
    %142 = arith.mulf %141, %139 : vector<8x8xf32>
    %143 = vector.shape_cast %142 : vector<8x8xf32> to vector<1x8x8xf32>
    %cst_46 = arith.constant dense<0.000000e+00> : vector<1xf32>
    %144 = vector.multi_reduction <add>, %143, %cst_46 [1, 2] : vector<1x8x8xf32> to vector<1xf32>
    %145 = vector.shape_cast %144 : vector<1xf32> to vector<1x1x1xf32>
    %146 = vector.extract %145[0, 0, 0] : f32 from vector<1x1x1xf32>
    %cst_47 = arith.constant 6.250000e-02 : f32
    %147 = arith.mulf %146, %cst_47 : f32
    %c0_48 = arith.constant 0 : index
    %c0_49 = arith.constant 0 : index
    %148 = memref.load %arg7[%c0_48, %c0_49] : memref<1x1xf32, #tpu.memory_space<smem>>
    memref.store %147, %arg7[%c0_48, %c0_49] : memref<1x1xf32, #tpu.memory_space<smem>>
    return
  }
}

</mosaic_0001>

<bundles_post_ra>
// kernel: clip_forward.1
= control target key start
LH: loop header
LB: loop body
LE: loop exit
PB: predicated region body
PF: predicated region fallthrough
CT: control target
= control target key end

     0   :  { %s1039_s0 = inlined_call_operand.vmem [shape: f32[8,256], index: 0, kind: input, shape index: {}]   ;;  %s1040_s1 = inlined_call_operand.vmem [shape: f32[8,128], index: 1, kind: input, shape index: {}]   ;;  %s1041_s2 = inlined_call_operand.vmem [shape: bf16[256,128], index: 2, kind: input, shape index: {}]   ;;  %s1042_s3 = inlined_call_operand.vmem [shape: bf16[128,128], index: 3, kind: input, shape index: {}]   ;;  %s1043_s4 = inlined_call_operand.vmem [shape: bf16[128,128], index: 4, kind: input, shape index: {}]   ;;  %s1044_s5 = inlined_call_operand.vmem [shape: bf16[128,128], index: 5, kind: input, shape index: {}]   ;;  %s1045_s6 = inlined_call_operand.vmem [shape: f32[8,128], index: 6, kind: input, shape index: {}]   ;;  %s1046_s7 = inlined_call_operand.hbm [shape: f32[1,1], index: 7, kind: output, shape index: {}]  }
   0x1   :  { %v777_v0 = vld [vmem:[%s1041_s2 + $0x38] sm:$0xff]  ;;  %v776_v3 = vld [vmem:[%s1041_s2 + $0x30] sm:$0xff]  ;;  %v775_v6 = vld [vmem:[%s1041_s2 + $0x28] sm:$0xff] }
   0x2   :  { %v785_v1 = vld [vmem:[%s1041_s2 + $0x78] sm:$0xff]  ;;  %178 = vmatpush.bf16.msra.mxu0 %v777_v0  ;;  %v784_v4 = vld [vmem:[%s1041_s2 + $0x70] sm:$0xff]  ;;  %v783_v7 = vld [vmem:[%s1041_s2 + $0x68] sm:$0xff] }
   0x3   :  { %v801_v2 = vld [vmem:[%s1043_s4 + $0x38] sm:$0xff]  ;;  %191 = vmatpush.bf16.msra.mxu1 %v785_v1  ;;  %v800_v5 = vld [vmem:[%s1043_s4 + $0x30] sm:$0xff]  ;;  %v799_v8 = vld [vmem:[%s1043_s4 + $0x28] sm:$0xff] }
   0x4   :  { %384 = vmatpush.bf16.msra.mxu3 %v801_v2  ;;  %v793_v9 = vld [vmem:[%s1042_s3 + $0x38] sm:$0xff] }
   0x6   :  { %179 = vmatpush.bf16.msra.mxu0 %v776_v3 }
   0x7   :  { %192 = vmatpush.bf16.msra.mxu1 %v784_v4 }
   0x8   :  { %385 = vmatpush.bf16.msra.mxu3 %v800_v5 }
   0x9   :  { %12 = vsyncpa [#allocation3], 0  ;;  %v774_v10 = vld [vmem:[%s1041_s2 + $0x20] sm:$0xff]  ;;  %263 = vmatpush.bf16.msra.mxu2 %v793_v9  ;;  %v773_v13 = vld [vmem:[%s1041_s2 + $0x18] sm:$0xff]  ;;  %vm536_vm6 = vcmask 64512   ;;  %s847_s14 = smov [#allocation2]  }
   0xa   :  { %180 = vmatpush.bf16.msra.mxu0 %v775_v6  ;;  %v782_v11 = vld [vmem:[%s1041_s2 + $0x60] sm:$0xff]  ;;  %v781_v14 = vld [vmem:[%s1041_s2 + $0x58] sm:$0xff]  ;;  %v772_v16 = vld [vmem:[%s1041_s2 + $0x10] sm:$0xff] }
   0xb   :  { %193 = vmatpush.bf16.msra.mxu1 %v783_v7  ;;  %v798_v12 = vld [vmem:[%s1043_s4 + $0x20] sm:$0xff]  ;;  %v797_v15 = vld [vmem:[%s1043_s4 + $0x18] sm:$0xff]  ;;  %v780_v17 = vld [vmem:[%s1041_s2 + $0x50] sm:$0xff] }
   0xc   :  { %386 = vmatpush.bf16.msra.mxu3 %v799_v8  ;;  %v796_v18 = vld [vmem:[%s1043_s4 + $0x10] sm:$0xff]  ;;  %v771_v19 = vld [vmem:[%s1041_s2 + $0x8] sm:$0xff]  ;;  %v770_v22 = vld [vmem:[%s1041_s2] sm:$0xff] }
   0xd   :  { %v779_v20 = vld [vmem:[%s1041_s2 + $0x48] sm:$0xff]  ;;  %v778_v23 = vld [vmem:[%s1041_s2 + $0x40] sm:$0xff]  ;;  %v792_v31 = vld [vmem:[%s1042_s3 + $0x30] sm:$0xff] }
   0xe   :  { %181 = vmatpush.bf16.msra.mxu0 %v774_v10  ;;  %v795_v21 = vld [vmem:[%s1043_s4 + $0x8] sm:$0xff]  ;;  %v29_v24 = vld [vmem:[%s1039_s0] sm:$0xff]  ;;  %v809_v32 = vld [vmem:[%s1044_s5 + $0x38] sm:$0xff]  ;;  %264 = vmatpush.bf16.msra.mxu2 %v792_v31 }
   0xf   :  { %194 = vmatpush.bf16.msra.mxu1 %v782_v11  ;;  %v30_v25 = vld [vmem:[%s1039_s0 + $0x8] sm:$0xff]  ;;  %v794_v26 = vld [vmem:[%s1043_s4] sm:$0xff]  ;;  %v79_v28 = vpack.c.bf16 %v29_v24, %v29_v24  ;;  %v808_v34 = vld [vmem:[%s1044_s5 + $0x30] sm:$0xff] }
  0x10   :  { %387 = vmatpush.bf16.msra.mxu3 %v798_v12  ;;  %v301_v27 = vld [vmem:[%s1040_s1] sm:$0xff]  ;;  %v80_v29 = vpack.c.bf16 %v30_v25, %v30_v25  ;;  %v791_v33 = vld [vmem:[%s1042_s3 + $0x28] sm:$0xff]  ;;  %v789_v37 = vld [vmem:[%s1042_s3 + $0x18] sm:$0xff] }
  0x11   :  { %v334_v30 = vpack.c.bf16 %v301_v27, %v301_v27  ;;  %v790_v35 = vld [vmem:[%s1042_s3 + $0x20] sm:$0xff]  ;;  %v807_v36 = vld [vmem:[%s1044_s5 + $0x28] sm:$0xff]  ;;  %v788_v39 = vld [vmem:[%s1042_s3 + $0x10] sm:$0xff] }
  0x12   :  { %182 = vmatpush.bf16.msra.mxu0 %v773_v13  ;;  %265 = vmatpush.bf16.msra.mxu2 %v791_v33  ;;  %v806_v38 = vld [vmem:[%s1044_s5 + $0x20] sm:$0xff]  ;;  %v805_v40 = vld [vmem:[%s1044_s5 + $0x18] sm:$0xff]  ;;  %v787_v41 = vld [vmem:[%s1042_s3 + $0x8] sm:$0xff] }
  0x13   :  { %195 = vmatpush.bf16.msra.mxu1 %v781_v14  ;;  %v804_v42 = vld [vmem:[%s1044_s5 + $0x10] sm:$0xff]  ;;  %v786_v43 = vld [vmem:[%s1042_s3] sm:$0xff]  ;;  %v803_v44 = vld [vmem:[%s1044_s5 + $0x8] sm:$0xff] }
  0x14   :  { %388 = vmatpush.bf16.msra.mxu3 %v797_v15  ;;  %v1017_v45 = vld [vmem:[%s1045_s6] sm:$0xff]  ;;  %s600_s6 = sshll.u32 %s1046_s7, 4  ;;  %s601_s6 = int_to_ptr.hbm [resolvable:$true] %s600_s6 }
  0x15   :  { %v802_v46 = vld [vmem:[%s1044_s5] sm:$0xff]  ;;  %v81_v47 = vperm.slane %v1017_v45, 0  ;;  %v335_v52 = vperm.slane %v1017_v45, 4  ;;  %v214_v14 = vperm.slane %v1017_v45, 1 }
  0x16   :  { %183 = vmatpush.bf16.msra.mxu0 %v772_v16  ;;  %266 = vmatpush.bf16.msra.mxu2 %v790_v35 }
  0x17   :  { %196 = vmatpush.bf16.msra.mxu1 %v780_v17 }
  0x18   :  { %389 = vmatpush.bf16.msra.mxu3 %v796_v18  ;;  %v407_v18 = vperm.slane %v1017_v45, 5 }
  0x1a   :  { %184 = vmatpush.bf16.msra.mxu0 %v771_v19  ;;  %267 = vmatpush.bf16.msra.mxu2 %v789_v37 }
  0x1b   :  { %197 = vmatpush.bf16.msra.mxu1 %v779_v20 }
  0x1c   :  { %390 = vmatpush.bf16.msra.mxu3 %v795_v21 }
  0x1e   :  { %185 = vmatpush.bf16.msra.mxu0 %v770_v22  ;;  %268 = vmatpush.bf16.msra.mxu2 %v788_v39 }
  0x1f   :  { %198 = vmatpush.bf16.msra.mxu1 %v778_v23 }
  0x20   :  { %391 = vmatpush.bf16.msra.mxu3 %v794_v26 }
  0x21   :  { %186 = vmatmul.bf16.vlgmr.msra.gmra.mxu0 %v79_v28 }
  0x22   :  { %199 = vmatmul.bf16.vlgmr.msra.gmra.mxu1 %v80_v29  ;;  %456 = vmatpush.bf16.msrb.mxu0 %v809_v32 }
  0x23   :  { %392 = vmatmul.bf16.vlgmr.msra.gmra.mxu3 %v334_v30  ;;  %269 = vmatpush.bf16.msra.mxu2 %v787_v41 }
  0x26   :  { %457 = vmatpush.bf16.msrb.mxu0 %v808_v34 }
  0x27   :  { %270 = vmatpush.bf16.msra.mxu2 %v786_v43 }
  0x2a   :  { %458 = vmatpush.bf16.msrb.mxu0 %v807_v36 }
  0x2e   :  { %459 = vmatpush.bf16.msrb.mxu0 %v806_v38 }
  0x32   :  { %460 = vmatpush.bf16.msrb.mxu0 %v805_v40 }
  0x36   :  { %461 = vmatpush.bf16.msrb.mxu0 %v804_v42 }
  0x3a   :  { %462 = vmatpush.bf16.msrb.mxu0 %v803_v44 }
  0x3e   :  { %463 = vmatpush.bf16.msrb.mxu0 %v802_v46 }
  0x9e   :  { %v187_v48 = vpop.f32.mrf.mxu0 }
  0x9f   :  { %v200_v49 = vpop.f32.mrf.mxu1  ;;  %v188_v50 = vadd.f32 %v187_v48, %v81_v47  ;;  %v297_v47 = vperm.slane %v1017_v45, 2 }
  0xa1   :  { %v201_v51 = vadd.f32 %v200_v49, %v188_v50 }
  0xa3   :  { %v205_v53 = vmul.f32 0.044715, %v201_v51  ;;  %v204_v5 = vmul.f32 0.5, %v201_v51 }
  0xa5   :  { %v206_v55 = vmul.f32 %v205_v53, %v201_v51 }
  0xa6   :  { %v393_v54 = vpop.f32.mrf.mxu3  ;;  %v189_v57 = vpop.f32.mrf.mxu0 }
  0xa7   :  { %v394_v56 = vadd.f32 %v393_v54, %v335_v52  ;;  %v202_v58 = vpop.f32.mrf.mxu1  ;;  %v207_v59 = vmul.f32 %v206_v55, %v201_v51 }
  0xa8   :  { %v490_v58 = vperm.slane %v1017_v45, 6 }
  0xa9   :  { %v398_v60 = vmul.f32 0.044715, %v394_v56  ;;  %v208_v61 = vadd.f32 %v207_v59, %v201_v51  ;;  %v397_v10 = vmul.f32 0.5, %v394_v56 }
  0xab   :  { %v399_v62 = vmul.f32 %v398_v60, %v394_v56  ;;  %v209_v63 = vmul.f32 0.7978846, %v208_v61  ;;  %v492_v61 = vperm.slane %v1017_v45, 7 }
  0xad   :  { %v400_v0 = vmul.f32 %v399_v62, %v394_v56  ;;  %813 = vtanh.f32 %v209_v63 }
  0xae   :  { %v395_v1 = vpop.f32.mrf.mxu3 }
  0xaf   :  { %v401_v2 = vadd.f32 %v400_v0, %v394_v56 }
  0xb1   :  { %v402_v3 = vmul.f32 0.7978846, %v401_v2 }
  0xb3   :  { %815 = vtanh.f32 %v402_v3  ;;  %v814_v4 = vpop.eup %813 }
  0xb4   :  { %v211_v6 = vadd.f32 1.0, %v814_v4 }
  0xb6   :  { %v212_v7 = vmul.f32 %v211_v6, %v204_v5 }
  0xb8   :  { %v213_v9 = vpack.c.bf16 %v212_v7, %v212_v7 }
  0xb9   :  { %v816_v8 = vpop.eup %815 }
  0xba   :  { %v404_v11 = vadd.f32 1.0, %v816_v8  ;;  %271 = vmatmul.bf16.vlgmr.msra.gmra.mxu2 %v213_v9 }
  0xbc   :  { %v405_v12 = vmul.f32 %v404_v11, %v397_v10 }
  0xbe   :  { %v406_v13 = vpack.c.bf16 %v405_v12, %v405_v12 }
  0xc0   :  { %464 = vmatmul.bf16.vlgmr.msrb.gmra.mxu0 %v406_v13 }
 0x13d   :  { %v465_v15 = vpop.f32.mrf.mxu0  ;;  %v272_v16 = vpop.f32.mrf.mxu2 }
 0x13e   :  { %v273_v17 = vadd.f32 %v272_v16, %v214_v14  ;;  %v466_v20 = vadd.f32 %v465_v15, %v407_v18 }
 0x140   :  { %v276_v19 = vadd.f32 %v273_v17, %v201_v51  ;;  %v469_v23 = vadd.f32 %v466_v20, %v394_v56  ;;  %v299_v51 = vperm.slane %v1017_v45, 3 }
 0x142   :  { %277 = vadd.xlane.f32.xlu0 %v276_v19 }
 0x145   :  { %v467_v21 = vpop.f32.mrf.mxu0  ;;  %v274_v22 = vpop.f32.mrf.mxu2 }
 0x14a   :  { %470 = vadd.xlane.f32.xlu0 %v469_v23 }
 0x1b5   :  { %v278_v24 = vpop.xlane.xlu0 %277 }
 0x1b6   :  { %v279_v25 = vmul.f32 0.0078125, %v278_v24 }
 0x1b8   :  { %v280_v26 = vsub.f32 %v276_v19, %v279_v25 }
 0x1ba   :  { %v281_v27 = vmul.f32 %v280_v26, %v280_v26 }
 0x1bc   :  { %282 = vadd.xlane.f32.xlu1 %v281_v27 }
 0x1bd   :  { %v471_v28 = vpop.xlane.xlu0 %470 }
 0x1be   :  { %v472_v29 = vmul.f32 0.0078125, %v471_v28 }
 0x1c0   :  { %v473_v30 = vsub.f32 %v469_v23, %v472_v29 }
 0x1c2   :  { %v474_v31 = vmul.f32 %v473_v30, %v473_v30 }
 0x1c4   :  { %475 = vadd.xlane.f32.xlu1 %v474_v31 }
 0x22f   :  { %v283_v32 = vpop.xlane.xlu1 %282 }
 0x230   :  { %v284_v33 = vmul.f32 0.0078125, %v283_v32 }
 0x232   :  { %v285_v34 = vadd.f32 1e-05, %v284_v33 }
 0x234   :  { %817 = vrsqrt.f32 %v285_v34  ;;  %vm292_vm1 = vweird.f32 %v285_v34 }
 0x237   :  { %v476_v35 = vpop.xlane.xlu1 %475 }
 0x238   :  { %v477_v36 = vmul.f32 0.0078125, %v476_v35 }
 0x23a   :  { %v818_v37 = vpop.eup %817  ;;  %v478_v38 = vadd.f32 1e-05, %v477_v36 }
 0x23b   :  { %v287_v39 = vmul.f32 %v818_v37, %v285_v34  ;;  %vm293_vm0 = vweird.f32 %v818_v37 }
 0x23c   :  { %819 = vrsqrt.f32 %v478_v38  ;;  %vm294_vm2 = vmor %vm292_vm1, %vm293_vm0  ;;  %vm485_vm4 = vweird.f32 %v478_v38 }
 0x23d   :  { %v288_v40 = vmul.f32 %v818_v37, %v287_v39 }
 0x23f   :  { %v289_v41 = vmul.f32 0.5, %v288_v40 }
 0x241   :  { %v290_v42 = vsub.f32 1.5, %v289_v41 }
 0x242   :  { %v820_v43 = vpop.eup %819 }
 0x243   :  { %v291_v44 = vmul.f32 %v818_v37, %v290_v42  ;;  %v480_v46 = vmul.f32 %v820_v43, %v478_v38  ;;  %vm486_vm3 = vweird.f32 %v820_v43 }
 0x244   :  { %vm487_vm5 = vmor %vm485_vm4, %vm486_vm3 }
 0x245   :  { %v295_v48 = vsel %vm294_vm2, %v818_v37, %v291_v44  ;;  %v481_v49 = vmul.f32 %v820_v43, %v480_v46 }
 0x246   :  { %v296_v50 = vmul.f32 %v295_v48, %v280_v26 }
 0x247   :  { %v482_v52 = vmul.f32 0.5, %v481_v49 }
 0x248   :  { %v298_v53 = vmul.f32 %v297_v47, %v296_v50 }
 0x249   :  { %v483_v54 = vsub.f32 1.5, %v482_v52 }
 0x24a   :  { %v300_v55 = vadd.f32 %v299_v51, %v298_v53 }
 0x24b   :  { %v484_v56 = vmul.f32 %v820_v43, %v483_v54 }
 0x24c   :  { %v494_v57 = vpack.c.bf16 %v300_v55, %v300_v55 }
 0x24d   :  { %v488_v59 = vsel %vm487_vm5, %v820_v43, %v484_v56 }
 0x24e   :  { %503 = vmatpush.bf16.xpose.msrb.mxu1 %v494_v57  ;;  %529 = vmatpush.bf16.xpose.msrb.mxu3 %v494_v57  ;;  %v489_v60 = vmul.f32 %v488_v59, %v473_v30 }
 0x250   :  { %v491_v62 = vmul.f32 %v490_v58, %v489_v60 }
 0x252   :  { %v493_v63 = vadd.f32 %v492_v61, %v491_v62 }
 0x254   :  { %v495_v0 = vpack.c.bf16 %v493_v63, %v493_v63 }
 0x255   :  { %530 = vmatmul.bf16.vlgmr.msrb.gmra.mxu3 %v494_v57 }
 0x256   :  { %504 = vmatmul.bf16.vlgmr.msrb.gmra.mxu1 %v495_v0  ;;  %516 = vmatpush.bf16.xpose.msrb.mxu2 %v495_v0 }
 0x25d   :  { %517 = vmatmul.bf16.vlgmr.msrb.gmra.mxu2 %v495_v0 }
 0x2d3   :  { %v505_v1 = vpop.f32.mrf.mxu1 }
 0x2d4   :  { %v548_v2 = vsel %vm536_vm6, %v505_v1, -inf }
 0x2d5   :  { %549 = vmax.xlane.f32.xlu2 %v548_v2  ;;  %v560_v20 = vrot.slane %v548_v2, 4 }
 0x2d7   :  { %v561_v21 = vmax.f32 %v548_v2, %v560_v20 }
 0x2d8   :  { %v531_v3 = vpop.f32.mrf.mxu3 }
 0x2d9   :  { %v562_v22 = vrot.slane %v561_v21, 2 }
 0x2db   :  { %v507_v4 = vpop.f32.mrf.mxu1  ;;  %v563_v23 = vmax.f32 %v561_v21, %v562_v22 }
 0x2dd   :  { %v564_v24 = vrot.slane %v563_v23, 1 }
 0x2df   :  { %v565_v25 = vmax.f32 %v563_v23, %v564_v24 }
 0x2e0   :  { %v518_v5 = vpop.f32.mrf.mxu2  ;;  %v533_v6 = vpop.f32.mrf.mxu3 }
 0x2e1   :  { %v532_v7 = vadd.f32 %v531_v3, %v518_v5  ;;  %v566_v26 = vsub.f32 %v505_v1, %v565_v25 }
 0x2e3   :  { %v535_v8 = vmul.f32 0.5, %v532_v7  ;;  %v567_v27 = vmul.f32 1.442695, %v566_v26 }
 0x2e5   :  { %v537_v45 = vsel %vm536_vm6, %v535_v8, -inf }
 0x2e6   :  { %538 = vmax.xlane.f32.xlu2 %v537_v45 }
 0x2e8   :  { %v520_v9 = vpop.f32.mrf.mxu2 }
 0x348   :  { %v550_v10 = vpop.xlane.xlu2 %549 }
 0x349   :  { %v551_v11 = vsub.f32 %v505_v1, %v550_v10 }
 0x34b   :  { %v552_v12 = vmul.f32 1.442695, %v551_v11 }
 0x34d   :  { %821 = vpow2.f32 %v552_v12 }
 0x353   :  { %v822_v13 = vpop.eup %821 }
 0x354   :  { %v554_v14 = vsel %vm536_vm6, %v822_v13, 0.0 }
 0x355   :  { %555 = vadd.xlane.f32.xlu0 %v554_v14 }
 0x359   :  { %v539_v15 = vpop.xlane.xlu2 %538 }
 0x35a   :  { %v540_v16 = vsub.f32 %v535_v8, %v539_v15 }
 0x35c   :  { %v541_v17 = vmul.f32 1.442695, %v540_v16 }
 0x35e   :  { %823 = vpow2.f32 %v541_v17 }
 0x35f   :  { %825 = vpow2.f32 %v567_v27 }
 0x364   :  { %v824_v18 = vpop.eup %823 }
 0x365   :  { %v543_v19 = vsel %vm536_vm6, %v824_v18, 0.0  ;;  %v826_v28 = vpop.eup %825 }
 0x366   :  { %544 = vadd.xlane.f32.xlu1 %v543_v19  ;;  %v569_v29 = vsel %vm536_vm6, %v826_v28, 0.0 }
 0x367   :  { %v570_v30 = vrot.slane %v569_v29, 4 }
 0x369   :  { %v571_v31 = vadd.f32 %v570_v30, %v569_v29 }
 0x36b   :  { %v572_v32 = vrot.slane %v571_v31, 2 }
 0x36d   :  { %v573_v33 = vadd.f32 %v572_v32, %v571_v31 }
 0x36f   :  { %v574_v34 = vrot.slane %v573_v33, 1 }
 0x371   :  { %v575_v36 = vadd.f32 %v574_v34, %v573_v33 }
 0x3c8   :  { %v556_v35 = vpop.xlane.xlu0 %555 }
 0x3c9   :  { %827 = vlog2.f32 %v556_v35 }
 0x3ca   :  { %829 = vlog2.f32 %v575_v36 }
 0x3cf   :  { %v828_v37 = vpop.eup %827 }
 0x3d0   :  { %v830_v39 = vpop.eup %829  ;;  %v558_v40 = vmul.f32 0.6931472, %v828_v37 }
 0x3d1   :  { %v577_v41 = vmul.f32 0.6931472, %v830_v39 }
 0x3d2   :  { %v559_v42 = vsub.f32 %v551_v11, %v558_v40 }
 0x3d3   :  { %v578_v46 = vsub.f32 %v566_v26, %v577_v41 }
 0x3d5   :  { %v579_v47 = vadd.f32 %v578_v46, %v559_v42 }
 0x3d9   :  { %v545_v38 = vpop.xlane.xlu1 %544 }
 0x3da   :  { %831 = vrcp.f32 %v545_v38 }
 0x3e0   :  { %v832_v43 = vpop.eup %831 }
 0x3e1   :  { %v547_v44 = vmul.f32 %v832_v43, %v824_v18 }
 0x3e3   :  { %v580_v48 = vsub.f32 0.0, %v547_v44 }
 0x3e5   :  { %v581_v49 = vmul.f32 %v580_v48, %v579_v47 }
 0x3e7   :  { %v582_v50 = vsel %vm536_vm6, %v581_v49, 0.0 }
 0x3e8   :  { %583 = vadd.xlane.f32.xlu2 %v582_v50 }
 0x45b   :  { %v584_v51 = vpop.xlane.xlu2 %583 }
 0x45c   :  { %v585_v52 = vrot.slane %v584_v51, 4 }
 0x45e   :  { %v586_v53 = vadd.f32 %v585_v52, %v584_v51 }
 0x460   :  { %v587_v54 = vrot.slane %v586_v53, 2 }
 0x462   :  { %v588_v55 = vadd.f32 %v587_v54, %v586_v53 }
 0x464   :  { %v589_v56 = vrot.slane %v588_v55, 1 }
 0x466   :  { %v590_v57 = vadd.f32 %v589_v56, %v588_v55 }
 0x468   :  { %810 = vpush %v590_v57 }
 0x499   :  { %s811_s4 = spop %810 }
 0x49a   :  { %s592_s13 = smul.f32 0.0625, %s811_s4 }
 0x49c   :  { %594 = sst [smem:[#allocation2]] %s592_s13 }
 0x49d   :  { %603 = dma.smem_to_hbm %s847_s14, 16, %s601_s6, [#allocation3]  }
 0x49e   :  { %845 = dma.done.wait [#allocation3], 16  }
 0x49f   :  { %846 = vsyncadd [#allocation3], 4294967280 }
 0x4a0   :  { %608 = sfence }
 0x4a1   :  { %609 = vsyncpa [#allocation3], 1 }

</bundles_post_ra>
